<compile_context>
chip_gen: v6e
topology: v6e:2x2x1
jax: 0.10.0
libtpu: 0.0.40
codegen_flags: <defaults>
</compile_context>

<pallas_src>
import functools

import jax
import jax.numpy as jnp
from jax.experimental import pallas as pl
from jax.experimental.pallas import tpu as pltpu


def _round_up(a, b):
    return (a + b - 1) // b * b


def _ln_leaky(h, gamma, beta, *, eps, slope):
    """f32 LayerNorm over the last dim followed by LeakyReLU (all on VPU/EUP)."""
    mu = jnp.mean(h, axis=-1, keepdims=True)
    d = h - mu
    var = jnp.mean(d * d, axis=-1, keepdims=True)
    h = d * jax.lax.rsqrt(var + eps) * gamma + beta
    return jnp.where(h > 0, h, slope * h)


def _colornet_kernel(x_ref, w1_ref, w2_ref, w3_ref, vec_ref, b3_ref, o_ref,
                     *, eps, slope):
    """Fused fc1 -> LN -> LeakyReLU -> fc2 -> LN -> LeakyReLU -> fc3 on one row tile.

    vec_ref packs [b1, g1, beta1, b2, g2, beta2] as a (6, H) f32 array (one DMA
    instead of six).  Dropout layers are identity in eval mode.
    """
    mm_dtype = w1_ref.dtype          # bf16 matmul operands, f32 accumulate.

    b1, g1, be1 = vec_ref[0:1, :], vec_ref[1:2, :], vec_ref[2:3, :]
    b2, g2, be2 = vec_ref[3:4, :], vec_ref[4:5, :], vec_ref[5:6, :]

    # In-kernel bf16 cast of the activations (x arrives as f32 straight from HBM).
    x = x_ref[...].astype(mm_dtype)

    h = jnp.dot(x, w1_ref[...], preferred_element_type=jnp.float32)
    h = _ln_leaky(h + b1, g1, be1, eps=eps, slope=slope)
    # Dropout(0.1): identity in eval mode.

    h = jnp.dot(h.astype(mm_dtype), w2_ref[...], preferred_element_type=jnp.float32)
    h = _ln_leaky(h + b2, g2, be2, eps=eps, slope=slope)
    # Dropout(0.1): identity in eval mode.

    o_ref[...] = (jnp.dot(h.astype(mm_dtype), w3_ref[...],
                          preferred_element_type=jnp.float32) + b3_ref[...])


def prepare_params(params, matmul_dtype=jnp.bfloat16):
    """One-time parameter prep, hoisted off the per-forward critical path.

    Casts weights to the MXU matmul dtype and packs the six per-feature f32
    vectors (b1, g1, beta1, b2, g2, beta2) into a single (6, H) array.
    """
    C = params["w3"].shape[1]
    vecs = jnp.stack(
        [params["b1"], params["g1"], params["beta1"],
         params["b2"], params["g2"], params["beta2"]], axis=0
    ).astype(jnp.float32)                                    # (6, H)
    return {
        "w1": params["w1"].astype(matmul_dtype),             # (D, H)
        "w2": params["w2"].astype(matmul_dtype),             # (H, H)
        "w3": params["w3"].astype(matmul_dtype),             # (H, C)
        "vecs": vecs,                                        # (6, H) f32
        "b3": params["b3"].reshape(1, C).astype(jnp.float32),  # (1, C) f32
        "eps": float(params["eps"]),
    }


def _pick_tile(n, tm):
    """Row-tile selection: big (amortize ~0.35us/step), but never leave a v7x
    TensorCore idle when there is enough work for two tiles."""
    tm_eff = max(8, min(tm, _round_up(n, 8)))
    if n > 8 and pl.cdiv(n, tm_eff) < 2:
        tm_eff = max(8, _round_up(pl.cdiv(n, 2), 8))
    return tm_eff


def colornet_forward(x, prep, *, tm=512):
    """Fused ColorNet forward.

    x: (N, in_features) or (..., in_features) float32.
    prep: output of prepare_params().  Returns (N, 3, num_bins) float32.
    """
    if x.ndim > 2:                           # mirrors x.view(-1, x.shape[-1])
        x = x.reshape(-1, x.shape[-1])
    x = x.astype(jnp.float32)

    N, D = x.shape
    H = prep["w1"].shape[1]
    C = prep["w3"].shape[1]                  # 3 * num_bins (exact, no lane padding)
    num_bins = C // 3

    tm_eff = _pick_tile(N, tm)
    grid = (pl.cdiv(N, tm_eff),)             # ragged last block handled by Pallas

    def const_spec(shape):
        # Grid-invariant blocks (weights / packed vectors): same block index every
        # step, so Pallas keeps them resident and skips re-fetch.
        return pl.BlockSpec(shape, lambda i: (0, 0))

    kernel = functools.partial(_colornet_kernel, eps=prep["eps"], slope=0.01)

    out = pl.pallas_call(
        kernel,
        out_shape=jax.ShapeDtypeStruct((N, C), jnp.float32),
        grid_spec=pl.GridSpec(
            grid=grid,
            in_specs=[
                pl.BlockSpec((tm_eff, D), lambda i: (i, 0)),   # x row tile (f32)
                const_spec((D, H)),                            # w1 (bf16)
                const_spec((H, H)),                            # w2 (bf16)
                const_spec((H, C)),                            # w3 (bf16)
                const_spec((6, H)),                            # packed LN/bias vectors
                const_spec((1, C)),                            # b3
            ],
            out_specs=pl.BlockSpec((tm_eff, C), lambda i: (i, 0)),
        ),
        compiler_params=pltpu.CompilerParams(
            dimension_semantics=("parallel",),                 # shard tiles across TCs
            vmem_limit_bytes=32 * 1024 * 1024,                 # > v5e default, <= physical everywhere
        ),
    )(x, prep["w1"], prep["w2"], prep["w3"], prep["vecs"], prep["b3"])

    return out.reshape(N, 3, num_bins)


def init_params(key, in_features, hidden_dim, num_bins):
    """Deterministic synthetic parameters (shapes from the nn.Module)."""
    keys = jax.random.split(key, 8)
    C = 3 * num_bins
    p = {}
    # Linear weights stored as (in, out) — transpose of PyTorch's (out, in).
    p["w1"] = jax.random.normal(keys[0], (in_features, hidden_dim), jnp.float32) * 0.1
    p["b1"] = jax.random.normal(keys[1], (hidden_dim,), jnp.float32) * 0.1
    p["w2"] = jax.random.normal(keys[2], (hidden_dim, hidden_dim), jnp.float32) * 0.1
    p["b2"] = jax.random.normal(keys[3], (hidden_dim,), jnp.float32) * 0.1
    p["w3"] = jax.random.normal(keys[4], (hidden_dim, C), jnp.float32) * 0.1
    p["b3"] = jax.random.normal(keys[5], (C,), jnp.float32) * 0.1
    # LayerNorm affine params (perturbed from the gamma=1/beta=0 init so the test
    # is non-trivial).
    for li, k in zip((1, 2), keys[6:8]):
        kg, kb = jax.random.split(k)
        p[f"g{li}"] = 1.0 + 0.1 * jax.random.normal(kg, (hidden_dim,), jnp.float32)
        p[f"beta{li}"] = 0.1 * jax.random.normal(kb, (hidden_dim,), jnp.float32)
    p["eps"] = 1e-5   # nn.LayerNorm default
    return p


def _reference_forward(x, params, *, matmul_dtype=None):
    """Pure-JAX reference (eval mode).  If matmul_dtype is given, matmul operands
    are rounded to that dtype to mirror what the kernel feeds the MXU."""
    if x.ndim > 2:
        x = x.reshape(-1, x.shape[-1])
    x = x.astype(jnp.float32)
    eps = params["eps"]

    def mm(a, w):
        if matmul_dtype is not None:
            a = a.astype(matmul_dtype).astype(jnp.float32)
            w = w.astype(matmul_dtype).astype(jnp.float32)
        return jnp.dot(a, w)

    def ln(h, g, b):
        mu = jnp.mean(h, axis=-1, keepdims=True)
        var = jnp.mean((h - mu) ** 2, axis=-1, keepdims=True)
        return (h - mu) / jnp.sqrt(var + eps) * g + b

    h = mm(x, params["w1"]) + params["b1"]
    h = jax.nn.leaky_relu(ln(h, params["g1"], params["beta1"]), 0.01)
    h = mm(h, params["w2"]) + params["b2"]
    h = jax.nn.leaky_relu(ln(h, params["g2"], params["beta2"]), 0.01)
    out = mm(h, params["w3"]) + params["b3"]
    C = params["w3"].shape[1]
    return out.reshape(-1, 3, C // 3)


if __name__ == "__main__":
    in_features, hidden_dim, num_bins = 16, 32, 10
    batch, seq = 2, 8                      # 3-D input exercises the flatten path -> N = 16

    key = jax.random.PRNGKey(0)
    k_x, k_p, k_x2 = jax.random.split(key, 3)
    x = jax.random.normal(k_x, (batch, seq, in_features), jnp.float32)
    params = init_params(k_p, in_features, hidden_dim, num_bins)
    prep = prepare_params(params)          # one-time prep, off the per-call path

    # Case 1: 3-D input, N divisible by the chosen tile.
    out = jax.block_until_ready(colornet_forward(x, prep))
    assert out.shape == (batch * seq, 3, num_bins)
    ref = _reference_forward(x, params, matmul_dtype=jnp.bfloat16)
    assert jnp.allclose(out, ref, atol=1e-2, rtol=1e-2), "mismatch vs reference (case 1)"

    # Case 2: 2-D input with N not a multiple of the tile (ragged last block path).
    x2 = jax.random.normal(k_x2, (20, in_features), jnp.float32)
    out2 = jax.block_until_ready(colornet_forward(x2, prep))
    assert out2.shape == (20, 3, num_bins)
    ref2 = _reference_forward(x2, params, matmul_dtype=jnp.bfloat16)
    assert jnp.allclose(out2, ref2, atol=1e-2, rtol=1e-2), "mismatch vs reference (case 2)"

    print("KERNEL_OK")
</pallas_src>

<mosaic_0001>
module attributes {stable_mosaic.version = 11 : i64} {
  func.func @_colornet_kernel(%arg0: i32, %arg1: memref<8x16xf32, #tpu.memory_space<vmem>>, %arg2: memref<16x32xbf16, #tpu.memory_space<vmem>>, %arg3: memref<32x32xbf16, #tpu.memory_space<vmem>>, %arg4: memref<32x30xbf16, #tpu.memory_space<vmem>>, %arg5: memref<6x32xf32, #tpu.memory_space<vmem>>, %arg6: memref<1x30xf32, #tpu.memory_space<vmem>>, %arg7: memref<8x30xf32, #tpu.memory_space<vmem>>) attributes {dimension_semantics = [#tpu.dimension_semantics<parallel>], iteration_bounds = array<i64: 2>, scalar_prefetch = 0 : i64, scratch_operands = 0 : i64, tpu.core_type = #tpu.core_type<tc>, window_params = [{transform_indices = @transform_0, window_bounds = array<i64: 8, 16>}, {pipeline_mode = #tpu.pipeline_mode<synchronous>, transform_indices = @transform_1, window_bounds = array<i64: 16, 32>}, {pipeline_mode = #tpu.pipeline_mode<synchronous>, transform_indices = @transform_2, window_bounds = array<i64: 32, 32>}, {pipeline_mode = #tpu.pipeline_mode<synchronous>, transform_indices = @transform_3, window_bounds = array<i64: 32, 30>}, {pipeline_mode = #tpu.pipeline_mode<synchronous>, transform_indices = @transform_4, window_bounds = array<i64: 6, 32>}, {pipeline_mode = #tpu.pipeline_mode<synchronous>, transform_indices = @transform_5, window_bounds = array<i64: 1, 30>}, {transform_indices = @transform_6, window_bounds = array<i64: 8, 30>}]} {
    %c0 = arith.constant 0 : index
    %c0_0 = arith.constant 0 : index
    %0 = vector.load %arg5[%c0, %c0_0] : memref<6x32xf32, #tpu.memory_space<vmem>>, vector<1x32xf32>
    %c1 = arith.constant 1 : index
    %c0_1 = arith.constant 0 : index
    %1 = vector.load %arg5[%c1, %c0_1] : memref<6x32xf32, #tpu.memory_space<vmem>>, vector<1x32xf32>
    %c2 = arith.constant 2 : index
    %c0_2 = arith.constant 0 : index
    %2 = vector.load %arg5[%c2, %c0_2] : memref<6x32xf32, #tpu.memory_space<vmem>>, vector<1x32xf32>
    %c3 = arith.constant 3 : index
    %c0_3 = arith.constant 0 : index
    %3 = vector.load %arg5[%c3, %c0_3] : memref<6x32xf32, #tpu.memory_space<vmem>>, vector<1x32xf32>
    %c4 = arith.constant 4 : index
    %c0_4 = arith.constant 0 : index
    %4 = vector.load %arg5[%c4, %c0_4] : memref<6x32xf32, #tpu.memory_space<vmem>>, vector<1x32xf32>
    %c5 = arith.constant 5 : index
    %c0_5 = arith.constant 0 : index
    %5 = vector.load %arg5[%c5, %c0_5] : memref<6x32xf32, #tpu.memory_space<vmem>>, vector<1x32xf32>
    %c0_6 = arith.constant 0 : index
    %c0_7 = arith.constant 0 : index
    %6 = vector.load %arg1[%c0_6, %c0_7] : memref<8x16xf32, #tpu.memory_space<vmem>>, vector<8x16xf32>
    %7 = arith.truncf %6 : vector<8x16xf32> to vector<8x16xbf16>
    %c0_8 = arith.constant 0 : index
    %c0_9 = arith.constant 0 : index
    %8 = vector.load %arg2[%c0_8, %c0_9] : memref<16x32xbf16, #tpu.memory_space<vmem>>, vector<16x32xbf16>
    %cst = arith.constant dense<0.000000e+00> : vector<8x32xf32>
    %9 = tpu.matmul %7, %8, %cst {dimension_numbers = #tpu.dot_dimension_numbers<[1], [0], [0], [1], [0, 0, 1, 1], [], []>} : vector<8x16xbf16>, vector<16x32xbf16>, vector<8x32xf32> -> vector<8x32xf32>
    %10 = vector.broadcast %0 : vector<1x32xf32> to vector<8x32xf32>
    %11 = arith.addf %9, %10 : vector<8x32xf32>
    %cst_10 = arith.constant dense<0.000000e+00> : vector<8xf32>
    %12 = vector.multi_reduction <add>, %11, %cst_10 [1] : vector<8x32xf32> to vector<8xf32>
    %13 = vector.shape_cast %12 : vector<8xf32> to vector<8x1xf32>
    %cst_11 = arith.constant 3.200000e+01 : f32
    %14 = vector.broadcast %cst_11 : f32 to vector<8x1xf32>
    %15 = arith.divf %13, %14 : vector<8x1xf32>
    %16 = vector.broadcast %15 : vector<8x1xf32> to vector<8x32xf32>
    %17 = arith.subf %11, %16 : vector<8x32xf32>
    %18 = arith.mulf %17, %17 : vector<8x32xf32>
    %cst_12 = arith.constant dense<0.000000e+00> : vector<8xf32>
    %19 = vector.multi_reduction <add>, %18, %cst_12 [1] : vector<8x32xf32> to vector<8xf32>
    %20 = vector.shape_cast %19 : vector<8xf32> to vector<8x1xf32>
    %cst_13 = arith.constant 3.200000e+01 : f32
    %21 = vector.broadcast %cst_13 : f32 to vector<8x1xf32>
    %22 = arith.divf %20, %21 : vector<8x1xf32>
    %cst_14 = arith.constant 9.99999974E-6 : f32
    %23 = vector.broadcast %cst_14 : f32 to vector<8x1xf32>
    %24 = arith.addf %22, %23 : vector<8x1xf32>
    %25 = math.rsqrt %24 : vector<8x1xf32>
    %26 = vector.broadcast %25 : vector<8x1xf32> to vector<8x32xf32>
    %27 = arith.mulf %17, %26 : vector<8x32xf32>
    %28 = vector.broadcast %1 : vector<1x32xf32> to vector<8x32xf32>
    %29 = arith.mulf %27, %28 : vector<8x32xf32>
    %30 = vector.broadcast %2 : vector<1x32xf32> to vector<8x32xf32>
    %31 = arith.addf %29, %30 : vector<8x32xf32>
    %cst_15 = arith.constant 0.000000e+00 : f32
    %32 = vector.broadcast %cst_15 : f32 to vector<8x32xf32>
    %33 = arith.cmpf ogt, %31, %32 : vector<8x32xf32>
    %cst_16 = arith.constant 0.00999999977 : f32
    %34 = vector.broadcast %cst_16 : f32 to vector<8x32xf32>
    %35 = arith.mulf %34, %31 : vector<8x32xf32>
    %36 = arith.select %33, %31, %35 : vector<8x32xi1>, vector<8x32xf32>
    %37 = arith.truncf %36 : vector<8x32xf32> to vector<8x32xbf16>
    %c0_17 = arith.constant 0 : index
    %c0_18 = arith.constant 0 : index
    %38 = vector.load %arg3[%c0_17, %c0_18] : memref<32x32xbf16, #tpu.memory_space<vmem>>, vector<32x32xbf16>
    %cst_19 = arith.constant dense<0.000000e+00> : vector<8x32xf32>
    %39 = tpu.matmul %37, %38, %cst_19 {dimension_numbers = #tpu.dot_dimension_numbers<[1], [0], [0], [1], [0, 0, 1, 1], [], []>} : vector<8x32xbf16>, vector<32x32xbf16>, vector<8x32xf32> -> vector<8x32xf32>
    %40 = vector.broadcast %3 : vector<1x32xf32> to vector<8x32xf32>
    %41 = arith.addf %39, %40 : vector<8x32xf32>
    %cst_20 = arith.constant dense<0.000000e+00> : vector<8xf32>
    %42 = vector.multi_reduction <add>, %41, %cst_20 [1] : vector<8x32xf32> to vector<8xf32>
    %43 = vector.shape_cast %42 : vector<8xf32> to vector<8x1xf32>
    %cst_21 = arith.constant 3.200000e+01 : f32
    %44 = vector.broadcast %cst_21 : f32 to vector<8x1xf32>
    %45 = arith.divf %43, %44 : vector<8x1xf32>
    %46 = vector.broadcast %45 : vector<8x1xf32> to vector<8x32xf32>
    %47 = arith.subf %41, %46 : vector<8x32xf32>
    %48 = arith.mulf %47, %47 : vector<8x32xf32>
    %cst_22 = arith.constant dense<0.000000e+00> : vector<8xf32>
    %49 = vector.multi_reduction <add>, %48, %cst_22 [1] : vector<8x32xf32> to vector<8xf32>
    %50 = vector.shape_cast %49 : vector<8xf32> to vector<8x1xf32>
    %cst_23 = arith.constant 3.200000e+01 : f32
    %51 = vector.broadcast %cst_23 : f32 to vector<8x1xf32>
    %52 = arith.divf %50, %51 : vector<8x1xf32>
    %cst_24 = arith.constant 9.99999974E-6 : f32
    %53 = vector.broadcast %cst_24 : f32 to vector<8x1xf32>
    %54 = arith.addf %52, %53 : vector<8x1xf32>
    %55 = math.rsqrt %54 : vector<8x1xf32>
    %56 = vector.broadcast %55 : vector<8x1xf32> to vector<8x32xf32>
    %57 = arith.mulf %47, %56 : vector<8x32xf32>
    %58 = vector.broadcast %4 : vector<1x32xf32> to vector<8x32xf32>
    %59 = arith.mulf %57, %58 : vector<8x32xf32>
    %60 = vector.broadcast %5 : vector<1x32xf32> to vector<8x32xf32>
    %61 = arith.addf %59, %60 : vector<8x32xf32>
    %cst_25 = arith.constant 0.000000e+00 : f32
    %62 = vector.broadcast %cst_25 : f32 to vector<8x32xf32>
    %63 = arith.cmpf ogt, %61, %62 : vector<8x32xf32>
    %cst_26 = arith.constant 0.00999999977 : f32
    %64 = vector.broadcast %cst_26 : f32 to vector<8x32xf32>
    %65 = arith.mulf %64, %61 : vector<8x32xf32>
    %66 = arith.select %63, %61, %65 : vector<8x32xi1>, vector<8x32xf32>
    %67 = arith.truncf %66 : vector<8x32xf32> to vector<8x32xbf16>
    %c0_27 = arith.constant 0 : index
    %c0_28 = arith.constant 0 : index
    %68 = vector.load %arg4[%c0_27, %c0_28] : memref<32x30xbf16, #tpu.memory_space<vmem>>, vector<32x30xbf16>
    %cst_29 = arith.constant dense<0.000000e+00> : vector<8x30xf32>
    %69 = tpu.matmul %67, %68, %cst_29 {dimension_numbers = #tpu.dot_dimension_numbers<[1], [0], [0], [1], [0, 0, 1, 1], [], []>} : vector<8x32xbf16>, vector<32x30xbf16>, vector<8x30xf32> -> vector<8x30xf32>
    %c0_30 = arith.constant 0 : index
    %c0_31 = arith.constant 0 : index
    %70 = vector.load %arg6[%c0_30, %c0_31] : memref<1x30xf32, #tpu.memory_space<vmem>>, vector<1x30xf32>
    %71 = vector.broadcast %70 : vector<1x30xf32> to vector<8x30xf32>
    %72 = arith.addf %69, %71 : vector<8x30xf32>
    %c0_32 = arith.constant 0 : index
    %c0_33 = arith.constant 0 : index
    %73 = vector.load %arg7[%c0_32, %c0_33] : memref<8x30xf32, #tpu.memory_space<vmem>>, vector<8x30xf32>
    tpu.vector_store %arg7[%c0_32, %c0_33], %72 {strides = array<i32>} : memref<8x30xf32, #tpu.memory_space<vmem>>, vector<8x30xf32>,
    return
  }
  func.func @transform_0(%arg0: i32) -> (i32, i32) {
    %c0_i32 = arith.constant 0 : i32
    %c0_i32_0 = arith.constant 0 : i32
    return %arg0, %c0_i32 : i32, i32
  }
  func.func @transform_1(%arg0: i32) -> (i32, i32) {
    %c0_i32 = arith.constant 0 : i32
    %c0_i32_0 = arith.constant 0 : i32
    %c0_i32_1 = arith.constant 0 : i32
    return %c0_i32, %c0_i32_0 : i32, i32
  }
  func.func @transform_2(%arg0: i32) -> (i32, i32) {
    %c0_i32 = arith.constant 0 : i32
    %c0_i32_0 = arith.constant 0 : i32
    %c0_i32_1 = arith.constant 0 : i32
    return %c0_i32, %c0_i32_0 : i32, i32
  }
  func.func @transform_3(%arg0: i32) -> (i32, i32) {
    %c0_i32 = arith.constant 0 : i32
    %c0_i32_0 = arith.constant 0 : i32
    %c0_i32_1 = arith.constant 0 : i32
    return %c0_i32, %c0_i32_0 : i32, i32
  }
  func.func @transform_4(%arg0: i32) -> (i32, i32) {
    %c0_i32 = arith.constant 0 : i32
    %c0_i32_0 = arith.constant 0 : i32
    %c0_i32_1 = arith.constant 0 : i32
    return %c0_i32, %c0_i32_0 : i32, i32
  }
  func.func @transform_5(%arg0: i32) -> (i32, i32) {
    %c0_i32 = arith.constant 0 : i32
    %c0_i32_0 = arith.constant 0 : i32
    %c0_i32_1 = arith.constant 0 : i32
    return %c0_i32, %c0_i32_0 : i32, i32
  }
  func.func @transform_6(%arg0: i32) -> (i32, i32) {
    %c0_i32 = arith.constant 0 : i32
    %c0_i32_0 = arith.constant 0 : i32
    return %arg0, %c0_i32 : i32, i32
  }
}

</mosaic_0001>

<bundles_post_ra>
// kernel: tpu_custom_call.1
= control target key start
LH: loop header
LB: loop body
LE: loop exit
PB: predicated region body
PF: predicated region fallthrough
CT: control target
= control target key end

     0   :  { %s1349_s0 = inlined_call_operand.hbm [shape: f32[16,16], index: 0, kind: input, shape index: {}]   ;;  %s1350_s1 = inlined_call_operand.hbm [shape: bf16[16,32], index: 1, kind: input, shape index: {}]   ;;  %s1351_s2 = inlined_call_operand.hbm [shape: bf16[32,32], index: 2, kind: input, shape index: {}]   ;;  %s1352_s3 = inlined_call_operand.hbm [shape: bf16[32,30], index: 3, kind: input, shape index: {}]   ;;  %s1353_s4 = inlined_call_operand.hbm [shape: f32[6,32], index: 4, kind: input, shape index: {}]   ;;  %s1354_s5 = inlined_call_operand.vmem [shape: f32[1,30], index: 5, kind: input, shape index: {}]   ;;  %s1355_s6 = inlined_call_operand.hbm [shape: f32[16,30], index: 6, kind: output, shape index: {}]  }
   0x1   :  { %1360 = sst [smem:[#allocation16_spill]] %s1350_s1 }
   0x2   :  { %11 = vsyncpa [#allocation3], 0 }
   0x3   :  { %13 = vsyncpa [#allocation3 + $0x1], 0 }
   0x4   :  { %14 = vsyncpa [#allocation6], 0 }
   0x5   :  { %15 = vsyncpa [#allocation9], 0 }
   0x6   :  { %16 = vsyncpa [#allocation4], 0 }
   0x7   :  { %18 = vsyncpa [#allocation4 + $0x1], 0  ;;  %s1113_s21 = smov 0   ;;  %s1115_s22 = smov 0  }
   0x8   :  { %s1117_s23 = smov 0   ;;  %s1119_s24 = smov 0  }
   0x9 LB: > { %s1068_s25 = smov [#allocation5]   ;;  %s1134_s27 = sadd.s32 4294967295, %s1066_s24   ;;  %s1066_s24 = sphi %s1119_s24, %s1381_s24   ;;  %s1062_s23 = sphi %s1117_s23, %s1380_s23   ;;  %s1058_s22 = sphi %s1115_s22, %s1379_s22   ;;  %s1054_s21 = sphi %s1113_s21, %s1378_s21  }
   0xa   : > { %s198_s26 = sshll.u32 %s1068_s25, 4  ;;  %p698_p0 = scmp.ge.s32.totalorder %s1066_s24, 1  ;;  %s199_s26 = int_to_ptr.vmem [resolvable:$true] %s198_s26 }
   0xb   : > { %p1356_p1 = scmp.eq.s32.totalorder %s1134_s27, 0  ;;  %p186_p2 = scmp.lt.s32.totalorder %s1066_s24, 3 }
   0xc   : > { %s1069_s29 = smov [#allocation8]   ;;  %s1070_s8 = smov [#allocation7]  }
   0xd   : > { %p1139_p3 = pnand %p698_p0, %p186_p2  ;;  %s224_s30 = sshll.u32 %s1069_s29, 4  ;;  %s1152_s30 = int_to_ptr.vmem [resolvable:$true] %s224_s30 }
   0xe   : > { %s211_s9 = sshll.u32 %s1070_s8, 4  ;;  %s873_s10 = scalar_lea.vmem %s199_s26, 128  ;;  %s1154_s9 = int_to_ptr.vmem [resolvable:$true] %s211_s9 }
   0xf   : > { %s1361_s28 = scalar_select %p1139_p3, 1, 0 }
  0x10   : > { %p782_p5 = pneg %p1139_p3  ;;  %p874_p8 = scmp.ne.s32.totalorder %s199_s26, %s873_s10 }
  0x11   : > { %p881_p11 = scmp.lt.s32.totalorder %s199_s26, %s199_s26  ;;  %p882_p12 = scmp.lt.s32.totalorder %s873_s10, %s873_s10 }
  0x12   : > { %p1148_p6 = pnand %p782_p5, %p1356_p1 }
  0x13   : > { %p883_p13 = por %p882_p12, %p881_p11 }
  0x14   : > { %p864_p7 = pneg %p1148_p6 }
  0x16   : > { %p876_p9 = pnand %p874_p8, %p864_p7 }
  0x18   : > { %p877_p10 = pneg %p876_p9 }
  0x1a   : > { %p884_p0 = pnand %p883_p13, %p877_p10 }
  0x1c   : > { %887 = shalt.err (!%p884_p0)
}
  0x1d   : > { %s1071_s11 = smov 64   ;;  %s1072_s12 = smov 4  }
  0x1e   : > { %s1363_s1 = sld [smem:[#allocation16_spill]]  ;;  %s899_s15 = scalar_lea.vmem %s1152_s30, 256 }
  0x1f   : > { %p900_p2 = scmp.ne.s32.totalorder %s1152_s30, %s899_s15  ;;  %p907_p9 = scmp.lt.s32.totalorder %s1152_s30, %s1152_s30 }
  0x20   : > { %p908_p10 = scmp.lt.s32.totalorder %s899_s15, %s899_s15 }
  0x21   : > { %p902_p5 = pnand %p900_p2, %p864_p7 }
  0x22   : > { %p909_p11 = por %p908_p10, %p907_p9 }
  0x23   : > { %p903_p8 = pneg %p902_p5 }
  0x24   : > { %785 = dma.hbm_to_vmem [thread:$0]  (!%p1148_p6), %s1363_s1, 128, %s199_s26, [#allocation6], %s1071_s11, %s1071_s11, %s1072_s12  }
  0x25   : > { %p910_p12 = pnand %p909_p11, %p903_p8 }
  0x27   : > { %913 = shalt.err (!%p910_p12)
}
  0x28   : > { %791 = dma.hbm_to_vmem [thread:$0]  (!%p1148_p6), %s1352_s3, 256, %s1152_s30, [#allocation9], %s1071_s11, %s1071_s11, %s1072_s12  }
  0x29   : > { %s925_s18 = scalar_lea.vmem %s1154_s9, 256  ;;  %p933_p5 = scmp.lt.s32.totalorder %s1154_s9, %s1154_s9 }
  0x2a   : > { %p926_p13 = scmp.ne.s32.totalorder %s1154_s9, %s925_s18  ;;  %p934_p8 = scmp.lt.s32.totalorder %s925_s18, %s925_s18 }
  0x2c   : > { %p928_p0 = pnand %p926_p13, %p864_p7  ;;  %p935_p9 = por %p934_p8, %p933_p5 }
  0x2e   : > { %p929_p2 = pneg %p928_p0 }
  0x30   : > { %p936_p10 = pnand %p935_p9, %p929_p2 }
  0x32   : > { %939 = shalt.err (!%p936_p10)
}
  0x33   : > { %788 = dma.hbm_to_vmem [thread:$0]  (!%p1148_p6), %s1351_s2, 256, %s1154_s9, [#allocation6], %s1071_s11, %s1071_s11, %s1072_s12  }
  0x34   : > { %s1073_s25 = smov [#allocation10]  }
  0x35   : > { %s238_s26 = sshll.u32 %s1073_s25, 4  ;;  %s239_s26 = int_to_ptr.vmem [resolvable:$true] %s238_s26 }
  0x36   : > { %s951_s29 = scalar_lea.vmem %s239_s26, 128  ;;  %p959_p0 = scmp.lt.s32.totalorder %s239_s26, %s239_s26 }
  0x37   : > { %p952_p11 = scmp.ne.s32.totalorder %s239_s26, %s951_s29  ;;  %p960_p2 = scmp.lt.s32.totalorder %s951_s29, %s951_s29 }
  0x39   : > { %p954_p12 = pnand %p952_p11, %p864_p7  ;;  %p961_p5 = por %p960_p2, %p959_p0 }
  0x3b   : > { %p955_p13 = pneg %p954_p12 }
  0x3d   : > { %p962_p8 = pnand %p961_p5, %p955_p13 }
  0x3f   : > { %965 = shalt.err (!%p962_p8)
}
  0x40   : > { %794 = dma.hbm_to_vmem [thread:$0]  (!%p1148_p6), %s1353_s4, 128, %s239_s26, [#allocation9]  }
  0x41   : > { %s697_s9 = sadd.s32 4294967294, %s1066_s24   ;;  %s1202_s7 = sadd.s32 1, %s1066_s24  }
  0x42   : > { %s28_s10 = ssub.s32 %s1066_s24, %s1202_s7  ;;  %s31_s11 = sadd.s32 1, %s1062_s23 }
  0x43   : > { %p29_p7 = scmp.eq.s32.totalorder %s28_s10, 0  ;;  %p38_p9 = scmp.ne.s32.totalorder %s1062_s23, %s1058_s22 }
  0x44   : > { %p39_p10 = scmp.eq.s32.totalorder %s1066_s24, 0  ;;  %p44_p11 = scmp.ne.s32.totalorder %s1058_s22, %s1054_s21 }
  0x45   : > { %s1213_s12 = scalar_select %p29_p7, %s1062_s23, %s31_s11  }
  0x46   : > { %p1215_p12 = por %p39_p10, %p38_p9  ;;  %p1221_p6 = por %p1356_p1, %p44_p11 }
  0x47   : > { %p173_p13 = scmp.eq.s32.totalorder %s1134_s27, 1  ;;  %p179_p0 = scmp.eq.s32.totalorder %s697_s9, 1 }
  0x48   : > { %s1365_s14 = scalar_select %p1221_p6, 1, 0 }
  0x49   : > { %p807_p2 = scmp.lt.s32.totalorder %s1066_s24, 2  ;;  %s252_s15 = sand.u32 1, %s1062_s23  }
  0x4a   : > { %p1228_p5 = por %p173_p13, %p38_p9  ;;  %p1232_p8 = por %p179_p0, %p44_p11 }
  0x4b   : > { %s704_s18 = sshll.u32 %s252_s15, 3  ;;  %s705_s19 = sshll.u32 %s1066_s24, 7 }
  0x4c   : > { %s1366_s16 = scalar_select %p1228_p5, 1, 0 }
  0x4d   : > { %s1367_s17 = scalar_select %p1232_p8, 1, 0 }
  0x4e   : > { %s1240_s26 = scalar_lea.hbm %s1349_s0, %s705_s19  ;;  %s256_s29 = scalar_lea.vmem [#allocation2], %s704_s18 }
  0x4f   : > { %s263_s30 = sshll.u32 %s256_s29, 4  ;;  %p1244_p7 = pnand %p807_p2, %p1215_p12  ;;  %s264_s30 = int_to_ptr.vmem [resolvable:$true] %s263_s30 }
  0x50   : > { %s253_s9 = scalar_lea.sflag [#allocation3], %s252_s15  ;;  %s966_s10 = scalar_lea.hbm %s1240_s26, 128 }
  0x51   : > { %p967_p9 = scmp.ne.s32.totalorder %s1240_s26, %s966_s10  ;;  %p968_p10 = pneg %p1244_p7 }
  0x52   : > { %s971_s20 = scalar_lea.hbm %s1349_s0, 256  ;;  %p972_p0 = scmp.lt.s32.totalorder %s1240_s26, %s1349_s0 }
  0x53   : > { %p969_p11 = pnand %p968_p10, %p967_p9  ;;  %p973_p12 = scmp.lt.s32.totalorder %s971_s20, %s966_s10 }
  0x55   : > { %p970_p13 = pneg %p969_p11  ;;  %p974_p2 = por %p973_p12, %p972_p0 }
  0x57   : > { %p975_p4 = pnand %p974_p2, %p970_p13 }
  0x59   : > { %978 = shalt.err (!%p975_p4)
}
  0x5a   : > { %s979_s13 = scalar_lea.vmem %s264_s30, 128  ;;  %s1074_s15 = smov [#allocation2]  }
  0x5b   : > { %p980_p1 = scmp.ne.s32.totalorder %s264_s30, %s979_s13  ;;  %s984_s29 = sshll.u32 %s1074_s15, 4  ;;  %s985_s29 = int_to_ptr.vmem [resolvable:$false] %s984_s29 }
  0x5c   : > { %s986_s1 = scalar_lea.vmem %s985_s29, 256  ;;  %p987_p9 = scmp.lt.s32.totalorder %s264_s30, %s985_s29 }
  0x5d   : > { %p982_p8 = pnand %p980_p1, %p968_p10  ;;  %p988_p11 = scmp.lt.s32.totalorder %s986_s1, %s979_s13 }
  0x5f   : > { %p983_p5 = pneg %p982_p8  ;;  %p989_p6 = por %p988_p11, %p987_p9 }
  0x61   : > { %p990_p3 = pnand %p989_p6, %p983_p5 }
  0x63   : > { %993 = shalt.err (!%p990_p3)
}
  0x64   : > { %798 = dma.hbm_to_vmem [thread:$0]  (!%p1244_p7), %s1240_s26, 128, %s264_s30, %s253_s9  }
  0x65   : > { %p1369_p13 = scmp.ne.s32.totalorder %s1361_s28, 0 }
  0x66   : > { %s1265_s10 = sand.u32 (!%p1369_p13), 1, %s1058_s22   ;;  %p1370_p1 = scmp.ne.s32.totalorder (!%p1369_p13), %s1365_s14, 0 }
  0x67   : > { %272 = sbr.rel (%p1369_p13) target bundleno = 1346 (0x542), region = 44  ;;  %s707_s11 = sshll.u32 (!%p1369_p13), %s1265_s10, 3 }
  0x68   : > { %s275_s19 = scalar_lea.sflag (!%p1369_p13), [#allocation3], %s1265_s10  ;;  %s278_s1 = scalar_lea.vmem (!%p1369_p13), [#allocation2], %s707_s11 }
  0x6c   : > { %1037 = dma.done.wait (%p1370_p1), %s275_s19, 128  }
  0x6d   : > { %1039 = vsyncadd (%p1370_p1), %s275_s19, 4294967168  ;;  %p1371_p3 = scmp.eq.s32.totalorder %s1134_s27, 0 }
  0x6f   : > { %1041 = dma.done.wait (%p1371_p3), [#allocation6], 384   ;;  %p1372_p4 = pmov %p1371_p3 }
  0x70   : > { %p1373_p6 = pmov %p1371_p3 }
  0x71   : > { %1043 = vsyncadd (%p1372_p4), [#allocation6], 4294966912 }
  0x72   : > { %1045 = dma.done.wait (%p1373_p6), [#allocation9], 384   ;;  %p1374_p5 = pmov %p1371_p3 }
  0x73   : > { %v1075_v0 = vmov 0.0   ;;  %vm1076_vm0 = vmmov 0   ;;  %v853_v1 = vld [vmem:[#allocation5] sm:$0xff]   ;;  %v330_v2 = vld [vmem:[%s278_s1] sm:$0xff]  ;;  %vm344_vm1 = vcmask 130048   ;;  %vm388_vm2 = vcmask 261120  }
  0x74   : > { %1047 = vsyncadd (%p1374_p5), [#allocation9], 4294966912  ;;  %740 = vmatprep.subr.bf16.mxu0 %v1075_v0  ;;  %742 = vmatprep.mubr.msk.bf16.mxu0 %vm1076_vm0, %v1075_v0  ;;  %v331_v3 = vpack.c.bf16 %v330_v2, %v330_v2  ;;  %v713_v4 = vld [vmem:[#allocation10] ss:$0 sm:$0xff]  ;;  %v854_v16 = vld [vmem:[#allocation7 + $0x8] sm:$0xff]   ;;  %s729_s26 = sshll.u32 %s1134_s27, 7 }
  0x75   : > { %746 = vmatprep.subr.bf16.mxu1 %v1075_v0  ;;  %750 = vmatprep.mubr.msk.bf16.mxu1 %vm1076_vm0, %v1075_v0  ;;  %v855_v17 = vld [vmem:[#allocation7] sm:$0xff]   ;;  %v856_v42 = vld [vmem:[#allocation8 + $0x8] sm:$0xff]   ;;  %v857_v43 = vld [vmem:[#allocation8] sm:$0xff]   ;;  %s322_s30 = scalar_lea.vmem [#allocation11], %s707_s11  ;;  %vm573_vm5 = vcmask 244736   ;;  %s1306_s18 = scalar_lea.hbm %s1355_s6, %s729_s26 }
  0x76   : > { %741 = vmatpush3.bf16.msra.mxu0 %v853_v1  ;;  %747 = vmatpush3.bf16.msra.mxu1 %v854_v16  ;;  %v716_v22 = vld [vmem:[#allocation10 + $0x1] ss:$0 sm:$0xff]  ;;  %v717_v24 = vld [vmem:[#allocation10 + $0x2] ss:$0 sm:$0xff]  ;;  %v718_v30 = vld [vmem:[#allocation10 + $0x3] ss:$0 sm:$0xff] }
  0x77   : > { %754 = vmatprep.subr.bf16.mxu0 %v1075_v0  ;;  %748 = vmatprep.subr.bf16.mxu1 %v1075_v0  ;;  %v722_v48 = vld [vmem:[#allocation10 + $0x4] ss:$0 sm:$0xff]  ;;  %v723_v50 = vld [vmem:[#allocation10 + $0x5] ss:$0 sm:$0xff]  ;;  %v724_v56 = vld [vmem:[%s1354_s5] ss:$0 sm:$0xff] }
  0x78   : > { %s589_s8 = sshll.u32 %s322_s30, 4  ;;  %s576_s27 = scalar_lea.sflag [#allocation4], %s1265_s10  ;;  %s1308_s8 = int_to_ptr.vmem [resolvable:$true] %s589_s8 }
  0x79   : > { %743 = vmatmul.mubr.msk.bf16.vlgmr.msra.gmra.mxu0 %vm344_vm1, %v331_v3  ;;  %s994_s25 = scalar_lea.vmem %s1308_s8, 128  ;;  %p1375_p7 = scmp.ne.s32.totalorder %s1366_s16, 0 }
  0x7a   : > { %758 = vmatprep.mubr.msk.bf16.mxu0 %vm1076_vm0, %v1075_v0  ;;  %749 = vmatpush3.bf16.msra.mxu1 %v855_v17  ;;  %p995_p8 = scmp.ne.s32.totalorder %s1308_s8, %s994_s25  ;;  %s1077_s13 = smov [#allocation11]  }
  0x7b   : > { %755 = vmatpush3.bf16.msra.mxu0 %v856_v42  ;;  %s998_s15 = sshll.u32 %s1077_s13, 4  ;;  %s999_s15 = int_to_ptr.vmem [resolvable:$false] %s998_s15 }
  0x7c   : > { %756 = vmatprep.subr.bf16.mxu0 %v1075_v0  ;;  %p996_p10 = pnand %p995_p8, %p1375_p7  ;;  %s1000_s29 = scalar_lea.vmem %s999_s15, 256 }
  0x7d   : > { %p1001_p12 = scmp.lt.s32.totalorder %s1308_s8, %s999_s15  ;;  %p1002_p2 = scmp.lt.s32.totalorder %s1000_s29, %s994_s25 }
  0x7e   : > { %p997_p0 = pneg %p996_p10 }
  0x7f   : > { %757 = vmatpush3.bf16.msra.mxu0 %v857_v43  ;;  %p1003_p9 = por %p1002_p2, %p1001_p12 }
  0x81   : > { %p1004_p11 = pnand %p1003_p9, %p997_p0 }
 0x139   : > { %v382_v5 = vpop.f32.mrf.mxu0 }
 0x13a   : > { %v383_v6 = vadd.f32 %v713_v4, %v382_v5 }
 0x13b   : > { %v744_v7 = vpop.f32.mrf.mxu0 }
 0x13c   : > { %v389_v8 = vsel %vm388_vm2, %v383_v6, 0.0 }
 0x13d   : > { %v385_v9 = vpop.f32.mrf.mxu0  ;;  %390 = vadd.xlane.f32.xlu0 %v389_v8 }
 0x13f   : > { %v745_v10 = vpop.f32.mrf.mxu0 }
 0x1c6   : > { %v391_v11 = vpop.xlane.xlu0 %390 }
 0x1c7   : > { %v393_v12 = vmul.f32 0.03125, %v391_v11 }
 0x1c9   : > { %v394_v13 = vsub.f32 %v383_v6, %v393_v12 }
 0x1cb   : > { %v395_v14 = vmul.f32 %v394_v13, %v394_v13 }
 0x1cd   : > { %v396_v15 = vsel %vm388_vm2, %v395_v14, 0.0 }
 0x1ce   : > { %397 = vadd.xlane.f32.xlu0 %v396_v15 }
 0x257   : > { %v398_v18 = vpop.xlane.xlu0 %397 }
 0x258   : > { %v399_v19 = vmul.f32 0.03125, %v398_v18 }
 0x25a   : > { %v400_v20 = vadd.f32 1e-05, %v399_v19 }
 0x25c   : > { %858 = vrsqrt.f32 %v400_v20 }
 0x269   : > { %v859_v21 = vpop.eup %858 }
 0x26a   : > { %v402_v23 = vmul.f32 %v859_v21, %v394_v13 }
 0x26c   : > { %v407_v25 = vmul.f32 %v716_v22, %v402_v23 }
 0x26e   : > { %v412_v26 = vadd.f32 %v717_v24, %v407_v25 }
 0x270   : > { %vm413_vm3 = vcmp.gt.f32.partialorder %v412_v26, 0.0  ;;  %v414_v27 = vmul.f32 0.01, %v412_v26 }
 0x272   : > { %v415_v28 = vsel %vm413_vm3, %v412_v26, %v414_v27 }
 0x273   : > { %v416_v29 = vpack.c.bf16 %v415_v28, %v415_v28 }
 0x275   : > { %751 = vmatmul.mubr.msk.bf16.vlgmr.msra.gmra.mxu1 %vm388_vm2, %v416_v29 }
 0x335   : > { %v474_v31 = vpop.f32.mrf.mxu1 }
 0x336   : > { %v475_v32 = vadd.f32 %v718_v30, %v474_v31 }
 0x337   : > { %v752_v33 = vpop.f32.mrf.mxu1 }
 0x338   : > { %v480_v34 = vsel %vm388_vm2, %v475_v32, 0.0 }
 0x339   : > { %481 = vadd.xlane.f32.xlu1 %v480_v34  ;;  %v477_v35 = vpop.f32.mrf.mxu1 }
 0x33b   : > { %v753_v36 = vpop.f32.mrf.mxu1 }
 0x3c2   : > { %v482_v37 = vpop.xlane.xlu1 %481 }
 0x3c3   : > { %v483_v38 = vmul.f32 0.03125, %v482_v37 }
 0x3c5   : > { %v484_v39 = vsub.f32 %v475_v32, %v483_v38 }
 0x3c7   : > { %v485_v40 = vmul.f32 %v484_v39, %v484_v39 }
 0x3c9   : > { %v486_v41 = vsel %vm388_vm2, %v485_v40, 0.0 }
 0x3ca   : > { %487 = vadd.xlane.f32.xlu1 %v486_v41 }
 0x453   : > { %v488_v44 = vpop.xlane.xlu1 %487 }
 0x454   : > { %v489_v45 = vmul.f32 0.03125, %v488_v44 }
 0x456   : > { %v490_v46 = vadd.f32 1e-05, %v489_v45 }
 0x458   : > { %860 = vrsqrt.f32 %v490_v46 }
 0x465   : > { %v861_v47 = vpop.eup %860 }
 0x466   : > { %v492_v49 = vmul.f32 %v861_v47, %v484_v39 }
 0x468   : > { %v497_v51 = vmul.f32 %v722_v48, %v492_v49 }
 0x46a   : > { %v502_v52 = vadd.f32 %v723_v50, %v497_v51 }
 0x46c   : > { %vm503_vm4 = vcmp.gt.f32.partialorder %v502_v52, 0.0  ;;  %v504_v53 = vmul.f32 0.01, %v502_v52 }
 0x46e   : > { %v505_v54 = vsel %vm503_vm4, %v502_v52, %v504_v53 }
 0x46f   : > { %v506_v55 = vpack.c.bf16 %v505_v54, %v505_v54 }
 0x471   : > { %759 = vmatmul.mubr.msk.bf16.vlgmr.msra.gmra.mxu0 %vm388_vm2, %v506_v55 }
 0x531   : > { %v567_v57 = vpop.f32.mrf.mxu0 }
 0x532   : > { %v568_v58 = vadd.f32 %v724_v56, %v567_v57 }
 0x533   : > { %v760_v59 = vpop.f32.mrf.mxu0 }
 0x534   : > { %574 = vst.msk [vmem:[%s322_s30] sm:$0xff] %vm573_vm5, %v568_v58 }
 0x535   : > { %v570_v60 = vpop.f32.mrf.mxu0 }
 0x536   : > { %1007 = shalt.err (!%p1004_p11)
}
 0x537   : > { %s1008_s11 = scalar_lea.hbm %s1306_s18, 128  ;;  %s1012_s1 = scalar_lea.hbm %s1355_s6, 256 }
 0x538   : > { %p1009_p13 = scmp.ne.s32.totalorder %s1306_s18, %s1008_s11  ;;  %p1013_p4 = scmp.lt.s32.totalorder %s1306_s18, %s1355_s6 }
 0x539   : > { %p1014_p6 = scmp.lt.s32.totalorder %s1012_s1, %s1008_s11 }
 0x53a   : > { %p1010_p1 = pnand %p1009_p13, %p1375_p7 }
 0x53b   : > { %p1015_p5 = por %p1014_p6, %p1013_p4 }
 0x53c   : > { %p1011_p3 = pneg %p1010_p1 }
 0x53e   : > { %p1016_p8 = pnand %p1015_p5, %p1011_p3 }
 0x540   : > { %1019 = shalt.err (!%p1016_p8)
}
 0x541   : > { %780 = dma.vmem_to_hbm [thread:$0]  (%p1375_p7), %s1308_s8, 128, %s1306_s18, %s576_s27   ;;  %v761_v61 = vpop.f32.mrf.mxu0 }
 0x542 PF: > { %s601_s26 = sand.u32 1, %s1054_s21   ;;  %p1376_p10 = scmp.ne.s32.totalorder %s1367_s17, 0 }
 0x543   : > { %p1377_p0 = scmp.ge.s32.totalorder %s1066_s24, 2  ;;  %s602_s30 = scalar_lea.sflag [#allocation4], %s601_s26 }
 0x545   : > { %p800_p12 = pnand %p1377_p0, %p1376_p10 }
 0x547   : > { %p801_p2 = pneg %p800_p12 }
 0x549   : > { %1049 = dma.done.wait (%p801_p2), %s602_s30, 128  }
 0x54a   : > { %1051 = vsyncadd (%p801_p2), %s602_s30, 4294967168  ;;  %p21_p9 = scmp.ge.s32.totalorder %s1202_s7, 4   ;;  %s1378_s21 = smov %s1058_s22 }
 0x54b   : > { %s1379_s22 = smov %s1062_s23  ;;  %s1380_s23 = smov %s1213_s12 }
 0x54c   : > { %s1381_s24 = smov %s1202_s7  ;;  %23 = sbr.rel (!%p21_p9) target bundleno = 9 (0x9), region = 105 }
 0x551   :  { %607 = vsyncpa [#allocation3], 1 }
 0x552   :  { %609 = vsyncpa [#allocation3 + $0x1], 1 }
 0x553   :  { %610 = vsyncpa [#allocation6], 1 }
 0x554   :  { %611 = vsyncpa [#allocation9], 1 }
 0x555   :  { %612 = vsyncpa [#allocation4], 1 }
 0x556   :  { %614 = vsyncpa [#allocation4 + $0x1], 1 }

</bundles_post_ra>
